<compile_context>
chip_gen: v7x
topology: tpu7x:2x2x1
jax: 0.10.0
libtpu: 0.0.40
codegen_flags: <defaults>
</compile_context>

<pallas_src>
import functools

import numpy as np

import jax
import jax.numpy as jnp
from jax.experimental import pallas as pl
from jax.experimental.pallas import tpu as pltpu

_NEG = -1e30  # masked-score value; large-negative (not -inf) so no NaNs ever


def _softmax_rows(s):
    # numerical_stability_softmax: subtract row max; divide via EUP reciprocal.
    m = jnp.max(s, axis=-1, keepdims=True)
    e = jnp.exp(s - m)
    return e * pl.reciprocal(jnp.sum(e, axis=-1, keepdims=True), approx=True)


# ---------------------------------------------------------------------------
# Fused per-class kernel (one grid step == one class)
#   inner:  E = X@W1 ; A = softmax(mask_blockdiag(E@E^T/sqrt(O))) ;
#           Y = X + relu((A@X)@Wt) * multi_mask
#   inter:  Fe = Y@Wx1 ; Pe = P@Wx2 ;
#           out = softmax(mask_validkeys(Pe@Fe^T/sqrt(O))) @ Y
# ---------------------------------------------------------------------------
def _graph_transformer_kernel(feats_ref, protos_ref, segc_ref, segr_ref,
                              mmask_ref, w_in1_ref, w_tr_ref, w_x1_ref,
                              w_x2_ref, out_ref, *, out_channels, matmul_dtype):
    scale = 1.0 / (out_channels ** 0.5)

    x = feats_ref[0]        # [M, C] f32 (zero rows where padded)
    seg_c = segc_ref[0]     # [M, 1] f32 segment id per row (-1 = pad)
    seg_r = segr_ref[0]     # [1, M] f32 same ids, lane-major
    mmask = mmask_ref[0]    # [M, 1] f32 1.0 only where the feat had >1 rows
    xd = x.astype(matmul_dtype)

    same_feat = seg_c == seg_r      # [M, M] block-diagonal (pad rows self-group)
    valid_key = seg_r >= 0.0        # [1, M] valid (non-pad) key columns

    # ----- inner: all per-feat self-attentions of the class at once --------
    e = jnp.dot(xd, w_in1_ref[...], preferred_element_type=jnp.float32)      # [M, O]
    ed = e.astype(matmul_dtype)
    s = jax.lax.dot_general(ed, ed, (((1,), (1,)), ((), ())),
                            preferred_element_type=jnp.float32) * scale      # [M, M]
    s = jnp.where(same_feat, s, _NEG)
    a = _softmax_rows(s)                                                     # [M, M]
    msg = jnp.dot(a.astype(matmul_dtype), xd,
                  preferred_element_type=jnp.float32)                        # [M, C]
    trans = jnp.dot(msg.astype(matmul_dtype), w_tr_ref[...],
                    preferred_element_type=jnp.float32)                      # [M, C]
    y = x + jnp.maximum(trans, 0.0) * mmask                                  # [M, C] f32
    yd = y.astype(matmul_dtype)

    # ----- inter: prototypes cross-attend over the concatenated feats ------
    protos = protos_ref[0]                                                   # [P, C]
    fe = jnp.dot(yd, w_x1_ref[...], preferred_element_type=jnp.float32)      # [M, O]
    pe = jnp.dot(protos.astype(matmul_dtype), w_x2_ref[...],
                 preferred_element_type=jnp.float32)                         # [P, O]
    s2 = jax.lax.dot_general(pe.astype(matmul_dtype), fe.astype(matmul_dtype),
                             (((1,), (1,)), ((), ())),
                             preferred_element_type=jnp.float32) * scale     # [P, M]
    s2 = jnp.where(valid_key, s2, _NEG)
    a2 = _softmax_rows(s2)                                                   # [P, M]
    out_ref[0] = jnp.dot(a2.astype(matmul_dtype), yd,
                         preferred_element_type=jnp.float32).astype(out_ref.dtype)


@functools.partial(jax.jit, static_argnames=("out_channels", "matmul_dtype"))
def graph_transformer_forward(feats_pad, protos, seg_col, seg_row, multi_mask,
                              w_in1, w_tr, w_x1, w_x2,
                              *, out_channels, matmul_dtype):
    k_cls, m, c = feats_pad.shape
    p = protos.shape[1]
    o = w_in1.shape[1]
    kernel = functools.partial(_graph_transformer_kernel,
                               out_channels=out_channels,
                               matmul_dtype=matmul_dtype)
    return pl.pallas_call(
        kernel,
        out_shape=jax.ShapeDtypeStruct((k_cls, p, c), jnp.float32),
        grid=(k_cls,),
        in_specs=[
            pl.BlockSpec((1, m, c), lambda k: (k, 0, 0)),   # feats slab
            pl.BlockSpec((1, p, c), lambda k: (k, 0, 0)),   # prototypes
            pl.BlockSpec((1, m, 1), lambda k: (k, 0, 0)),   # segment ids (column)
            pl.BlockSpec((1, 1, m), lambda k: (k, 0, 0)),   # segment ids (row)
            pl.BlockSpec((1, m, 1), lambda k: (k, 0, 0)),   # multi-row mask
            pl.BlockSpec((c, o), lambda k: (0, 0)),         # inner_w1  (VMEM-resident)
            pl.BlockSpec((c, c), lambda k: (0, 0)),         # inner_trans
            pl.BlockSpec((c, o), lambda k: (0, 0)),         # inter_w1
            pl.BlockSpec((c, o), lambda k: (0, 0)),         # inter_w2
        ],
        out_specs=pl.BlockSpec((1, p, c), lambda k: (k, 0, 0)),
        compiler_params=pltpu.CompilerParams(
            dimension_semantics=("parallel",)),
    )(feats_pad, protos, seg_col, seg_row, multi_mask,
      w_in1, w_tr, w_x1, w_x2)


# ---------------------------------------------------------------------------
# Module wrapper (mirrors GraphTransformer.forward); ragged list handling is
# host-side padding/mask construction feeding one fixed-shape batched kernel.
# ---------------------------------------------------------------------------
class GraphTransformerPallas:
    def __init__(self, in_channels, out_channels, key, matmul_dtype=jnp.bfloat16):
        self.in_channels = in_channels
        self.out_channels = out_channels
        self.matmul_dtype = matmul_dtype
        k1, k2, k3, k4 = jax.random.split(key, 4)
        bound = 1.0 / (in_channels ** 0.5)

        def init(k, shape):
            # nn.Linear-style uniform init; stored pre-transposed [in, out]
            # and already in the matmul compute dtype (no per-call casts).
            w = jax.random.uniform(k, shape, jnp.float32,
                                   minval=-bound, maxval=bound)
            return w.astype(matmul_dtype)

        self.inner_w1_t = init(k1, (in_channels, out_channels))
        self.inner_trans_t = init(k2, (in_channels, in_channels))
        self.inter_w1_t = init(k3, (in_channels, out_channels))
        self.inter_w2_t = init(k4, (in_channels, out_channels))

    def __call__(self, topk_feats, prototypes):
        num_class = len(prototypes)
        c = self.in_channels
        valid_feats = [[f for f in feats if f is not None] for feats in topk_feats]

        # Common padded geometry for every class (one compile per bucket).
        n_max = max((f.shape[0] for feats in valid_feats for f in feats), default=1)
        n_max = ((n_max + 7) // 8) * 8                  # sublane-align feat blocks
        b_max = max((len(feats) for feats in valid_feats), default=1)
        b_max = max(b_max, 1)
        m_pad = b_max * n_max
        # NOTE: m_pad depends on the data -> pad to a few fixed buckets in
        # production to avoid recompiles for every distinct (b_max, n_max).

        feats_blocks, seg_l, mmask_l = [], [], []
        for feats in valid_feats:
            blocks = []
            seg = np.full((m_pad,), -1.0, np.float32)   # feat id per row, -1 = pad
            multi = np.zeros((m_pad,), np.float32)      # 1.0 where feat had >1 rows
            for b in range(b_max):
                if b < len(feats):
                    f = jnp.asarray(feats[b], jnp.float32)
                    n = f.shape[0]
                    blocks.append(jnp.pad(f, ((0, n_max - n), (0, 0))))
                    seg[b * n_max:b * n_max + n] = float(b)
                    if n > 1:
                        multi[b * n_max:b * n_max + n] = 1.0
                else:
                    blocks.append(jnp.zeros((n_max, c), jnp.float32))
            feats_blocks.append(jnp.concatenate(blocks, axis=0))
            seg_l.append(seg)
            mmask_l.append(multi)

        feats_pad = jnp.stack(feats_blocks)                              # [K, M, C]
        protos = jnp.stack([jnp.asarray(p, jnp.float32) for p in prototypes])
        seg_np = np.stack(seg_l)                                         # [K, M]
        seg_col = jnp.asarray(seg_np[:, :, None])                        # [K, M, 1]
        seg_row = jnp.asarray(seg_np[:, None, :])                        # [K, 1, M]
        multi_mask = jnp.asarray(np.stack(mmask_l)[:, :, None])          # [K, M, 1]

        out = graph_transformer_forward(
            feats_pad, protos, seg_col, seg_row, multi_mask,
            self.inner_w1_t, self.inner_trans_t, self.inter_w1_t, self.inter_w2_t,
            out_channels=self.out_channels, matmul_dtype=self.matmul_dtype)
        return [out[k] for k in range(num_class)]


if __name__ == "__main__":
    in_channels, out_channels = 128, 64
    key = jax.random.PRNGKey(0)
    keys = jax.random.split(key, 8)

    model = GraphTransformerPallas(in_channels, out_channels, keys[0])

    # Three "classes":
    #  class 0: one multi-row feat, one single-row feat, one None
    #  class 1: one None, one multi-row feat
    #  class 2: all None -> zeros fallback path
    feat_a = jax.random.normal(keys[1], (8, in_channels), jnp.float32)
    feat_b = jax.random.normal(keys[2], (1, in_channels), jnp.float32)
    feat_c = jax.random.normal(keys[3], (8, in_channels), jnp.float32)
    protos0 = jax.random.normal(keys[4], (8, in_channels), jnp.float32)
    protos1 = jax.random.normal(keys[5], (8, in_channels), jnp.float32)
    protos2 = jax.random.normal(keys[6], (8, in_channels), jnp.float32)

    topk_feats = [[feat_a, feat_b, None], [None, feat_c], [None, None]]
    prototypes = [protos0, protos1, protos2]

    un_prototypes = model(topk_feats, prototypes)
    for o in un_prototypes:
        jax.block_until_ready(o)

    assert un_prototypes[0].shape == protos0.shape
    assert un_prototypes[1].shape == protos1.shape
    assert un_prototypes[2].shape == protos2.shape
    assert bool(jnp.all(un_prototypes[2] == 0.0))          # empty class -> zeros
    assert all(bool(jnp.all(jnp.isfinite(o))) for o in un_prototypes)
    print("KERNEL_OK")
</pallas_src>

<mosaic_0001>
module attributes {stable_mosaic.version = 11 : i64} {
  func.func @_graph_transformer_kernel(%arg0: i32, %arg1: memref<1x16x128xf32, #tpu.memory_space<vmem>>, %arg2: memref<1x8x128xf32, #tpu.memory_space<vmem>>, %arg3: memref<1x16x1xf32, #tpu.memory_space<vmem>>, %arg4: memref<1x1x16xf32, #tpu.memory_space<vmem>>, %arg5: memref<1x16x1xf32, #tpu.memory_space<vmem>>, %arg6: memref<128x64xbf16, #tpu.memory_space<vmem>>, %arg7: memref<128x128xbf16, #tpu.memory_space<vmem>>, %arg8: memref<128x64xbf16, #tpu.memory_space<vmem>>, %arg9: memref<128x64xbf16, #tpu.memory_space<vmem>>, %arg10: memref<1x8x128xf32, #tpu.memory_space<vmem>>) attributes {dimension_semantics = [#tpu.dimension_semantics<parallel>], iteration_bounds = array<i64: 3>, scalar_prefetch = 0 : i64, scratch_operands = 0 : i64, tpu.core_type = #tpu.core_type<tc>, window_params = [{transform_indices = @transform_0, window_bounds = array<i64: 1, 16, 128>}, {transform_indices = @transform_1, window_bounds = array<i64: 1, 8, 128>}, {transform_indices = @transform_2, window_bounds = array<i64: 1, 16, 1>}, {transform_indices = @transform_3, window_bounds = array<i64: 1, 1, 16>}, {transform_indices = @transform_4, window_bounds = array<i64: 1, 16, 1>}, {pipeline_mode = #tpu.pipeline_mode<synchronous>, transform_indices = @transform_5, window_bounds = array<i64: 128, 64>}, {pipeline_mode = #tpu.pipeline_mode<synchronous>, transform_indices = @transform_6, window_bounds = array<i64: 128, 128>}, {pipeline_mode = #tpu.pipeline_mode<synchronous>, transform_indices = @transform_7, window_bounds = array<i64: 128, 64>}, {pipeline_mode = #tpu.pipeline_mode<synchronous>, transform_indices = @transform_8, window_bounds = array<i64: 128, 64>}, {transform_indices = @transform_9, window_bounds = array<i64: 1, 8, 128>}]} {
    %c0 = arith.constant 0 : index
    %c0_0 = arith.constant 0 : index
    %c0_1 = arith.constant 0 : index
    %0 = vector.load %arg1[%c0, %c0_0, %c0_1] : memref<1x16x128xf32, #tpu.memory_space<vmem>>, vector<1x16x128xf32>
    %1 = vector.shape_cast %0 : vector<1x16x128xf32> to vector<16x128xf32>
    %c0_2 = arith.constant 0 : index
    %c0_3 = arith.constant 0 : index
    %c0_4 = arith.constant 0 : index
    %2 = vector.load %arg3[%c0_2, %c0_3, %c0_4] : memref<1x16x1xf32, #tpu.memory_space<vmem>>, vector<1x16x1xf32>
    %3 = vector.shape_cast %2 : vector<1x16x1xf32> to vector<16x1xf32>
    %c0_5 = arith.constant 0 : index
    %c0_6 = arith.constant 0 : index
    %c0_7 = arith.constant 0 : index
    %4 = vector.load %arg4[%c0_5, %c0_6, %c0_7] : memref<1x1x16xf32, #tpu.memory_space<vmem>>, vector<1x1x16xf32>
    %5 = vector.shape_cast %4 : vector<1x1x16xf32> to vector<1x16xf32>
    %c0_8 = arith.constant 0 : index
    %c0_9 = arith.constant 0 : index
    %c0_10 = arith.constant 0 : index
    %6 = vector.load %arg5[%c0_8, %c0_9, %c0_10] : memref<1x16x1xf32, #tpu.memory_space<vmem>>, vector<1x16x1xf32>
    %7 = vector.shape_cast %6 : vector<1x16x1xf32> to vector<16x1xf32>
    %8 = arith.truncf %1 : vector<16x128xf32> to vector<16x128xbf16>
    %9 = vector.broadcast %3 : vector<16x1xf32> to vector<16x16xf32>
    %10 = vector.broadcast %5 : vector<1x16xf32> to vector<16x16xf32>
    %11 = arith.cmpf oeq, %9, %10 : vector<16x16xf32>
    %cst = arith.constant 0.000000e+00 : f32
    %12 = vector.broadcast %cst : f32 to vector<1x16xf32>
    %13 = arith.cmpf oge, %5, %12 : vector<1x16xf32>
    %c0_11 = arith.constant 0 : index
    %c0_12 = arith.constant 0 : index
    %14 = vector.load %arg6[%c0_11, %c0_12] : memref<128x64xbf16, #tpu.memory_space<vmem>>, vector<128x64xbf16>
    %cst_13 = arith.constant dense<0.000000e+00> : vector<16x64xf32>
    %15 = tpu.matmul %8, %14, %cst_13 {dimension_numbers = #tpu.dot_dimension_numbers<[1], [0], [0], [1], [0, 0, 1, 1], [], []>} : vector<16x128xbf16>, vector<128x64xbf16>, vector<16x64xf32> -> vector<16x64xf32>
    %16 = arith.truncf %15 : vector<16x64xf32> to vector<16x64xbf16>
    %cst_14 = arith.constant dense<0.000000e+00> : vector<16x16xf32>
    %17 = tpu.matmul %16, %16, %cst_14 {dimension_numbers = #tpu.dot_dimension_numbers<[1], [1], [0], [0], [0, 0, 1, 0], [], []>} : vector<16x64xbf16>, vector<16x64xbf16>, vector<16x16xf32> -> vector<16x16xf32>
    %cst_15 = arith.constant 1.250000e-01 : f32
    %18 = vector.broadcast %cst_15 : f32 to vector<16x16xf32>
    %19 = arith.mulf %17, %18 : vector<16x16xf32>
    %cst_16 = arith.constant -1.000000e+30 : f32
    %20 = vector.broadcast %cst_16 : f32 to vector<16x16xf32>
    %21 = arith.select %11, %19, %20 : vector<16x16xi1>, vector<16x16xf32>
    %cst_17 = arith.constant dense<0xFF800000> : vector<16xf32>
    %22 = vector.multi_reduction <maximumf>, %21, %cst_17 [1] : vector<16x16xf32> to vector<16xf32>
    %23 = vector.shape_cast %22 : vector<16xf32> to vector<16x1xf32>
    %24 = vector.broadcast %23 : vector<16x1xf32> to vector<16x16xf32>
    %25 = arith.subf %21, %24 : vector<16x16xf32>
    %26 = math.exp %25 : vector<16x16xf32>
    %cst_18 = arith.constant dense<0.000000e+00> : vector<16xf32>
    %27 = vector.multi_reduction <add>, %26, %cst_18 [1] : vector<16x16xf32> to vector<16xf32>
    %28 = vector.shape_cast %27 : vector<16xf32> to vector<16x1xf32>
    %29 = tpu.reciprocal %28 {approx = true} : vector<16x1xf32> -> vector<16x1xf32>
    %30 = vector.broadcast %29 : vector<16x1xf32> to vector<16x16xf32>
    %31 = arith.mulf %26, %30 : vector<16x16xf32>
    %32 = arith.truncf %31 : vector<16x16xf32> to vector<16x16xbf16>
    %cst_19 = arith.constant dense<0.000000e+00> : vector<16x128xf32>
    %33 = tpu.matmul %32, %8, %cst_19 {dimension_numbers = #tpu.dot_dimension_numbers<[1], [0], [0], [1], [0, 0, 1, 1], [], []>} : vector<16x16xbf16>, vector<16x128xbf16>, vector<16x128xf32> -> vector<16x128xf32>
    %34 = arith.truncf %33 : vector<16x128xf32> to vector<16x128xbf16>
    %c0_20 = arith.constant 0 : index
    %c0_21 = arith.constant 0 : index
    %35 = vector.load %arg7[%c0_20, %c0_21] : memref<128x128xbf16, #tpu.memory_space<vmem>>, vector<128x128xbf16>
    %cst_22 = arith.constant dense<0.000000e+00> : vector<16x128xf32>
    %36 = tpu.matmul %34, %35, %cst_22 {dimension_numbers = #tpu.dot_dimension_numbers<[1], [0], [0], [1], [0, 0, 1, 1], [], []>} : vector<16x128xbf16>, vector<128x128xbf16>, vector<16x128xf32> -> vector<16x128xf32>
    %cst_23 = arith.constant 0.000000e+00 : f32
    %37 = vector.broadcast %cst_23 : f32 to vector<16x128xf32>
    %38 = arith.maximumf %36, %37 : vector<16x128xf32>
    %39 = vector.broadcast %7 : vector<16x1xf32> to vector<16x128xf32>
    %40 = arith.mulf %38, %39 : vector<16x128xf32>
    %41 = arith.addf %1, %40 : vector<16x128xf32>
    %42 = arith.truncf %41 : vector<16x128xf32> to vector<16x128xbf16>
    %c0_24 = arith.constant 0 : index
    %c0_25 = arith.constant 0 : index
    %c0_26 = arith.constant 0 : index
    %43 = vector.load %arg2[%c0_24, %c0_25, %c0_26] : memref<1x8x128xf32, #tpu.memory_space<vmem>>, vector<1x8x128xf32>
    %44 = vector.shape_cast %43 : vector<1x8x128xf32> to vector<8x128xf32>
    %c0_27 = arith.constant 0 : index
    %c0_28 = arith.constant 0 : index
    %45 = vector.load %arg8[%c0_27, %c0_28] : memref<128x64xbf16, #tpu.memory_space<vmem>>, vector<128x64xbf16>
    %cst_29 = arith.constant dense<0.000000e+00> : vector<16x64xf32>
    %46 = tpu.matmul %42, %45, %cst_29 {dimension_numbers = #tpu.dot_dimension_numbers<[1], [0], [0], [1], [0, 0, 1, 1], [], []>} : vector<16x128xbf16>, vector<128x64xbf16>, vector<16x64xf32> -> vector<16x64xf32>
    %47 = arith.truncf %44 : vector<8x128xf32> to vector<8x128xbf16>
    %c0_30 = arith.constant 0 : index
    %c0_31 = arith.constant 0 : index
    %48 = vector.load %arg9[%c0_30, %c0_31] : memref<128x64xbf16, #tpu.memory_space<vmem>>, vector<128x64xbf16>
    %cst_32 = arith.constant dense<0.000000e+00> : vector<8x64xf32>
    %49 = tpu.matmul %47, %48, %cst_32 {dimension_numbers = #tpu.dot_dimension_numbers<[1], [0], [0], [1], [0, 0, 1, 1], [], []>} : vector<8x128xbf16>, vector<128x64xbf16>, vector<8x64xf32> -> vector<8x64xf32>
    %50 = arith.truncf %49 : vector<8x64xf32> to vector<8x64xbf16>
    %51 = arith.truncf %46 : vector<16x64xf32> to vector<16x64xbf16>
    %cst_33 = arith.constant dense<0.000000e+00> : vector<8x16xf32>
    %52 = tpu.matmul %50, %51, %cst_33 {dimension_numbers = #tpu.dot_dimension_numbers<[1], [1], [0], [0], [0, 0, 1, 0], [], []>} : vector<8x64xbf16>, vector<16x64xbf16>, vector<8x16xf32> -> vector<8x16xf32>
    %cst_34 = arith.constant 1.250000e-01 : f32
    %53 = vector.broadcast %cst_34 : f32 to vector<8x16xf32>
    %54 = arith.mulf %52, %53 : vector<8x16xf32>
    %cst_35 = arith.constant -1.000000e+30 : f32
    %55 = vector.shape_cast %13 : vector<1x16xi1> to vector<1x16xi1>
    %56 = vector.broadcast %55 : vector<1x16xi1> to vector<8x16xi1>
    %57 = vector.broadcast %cst_35 : f32 to vector<8x16xf32>
    %58 = arith.select %56, %54, %57 : vector<8x16xi1>, vector<8x16xf32>
    %cst_36 = arith.constant dense<0xFF800000> : vector<8xf32>
    %59 = vector.multi_reduction <maximumf>, %58, %cst_36 [1] : vector<8x16xf32> to vector<8xf32>
    %60 = vector.shape_cast %59 : vector<8xf32> to vector<8x1xf32>
    %61 = vector.broadcast %60 : vector<8x1xf32> to vector<8x16xf32>
    %62 = arith.subf %58, %61 : vector<8x16xf32>
    %63 = math.exp %62 : vector<8x16xf32>
    %cst_37 = arith.constant dense<0.000000e+00> : vector<8xf32>
    %64 = vector.multi_reduction <add>, %63, %cst_37 [1] : vector<8x16xf32> to vector<8xf32>
    %65 = vector.shape_cast %64 : vector<8xf32> to vector<8x1xf32>
    %66 = tpu.reciprocal %65 {approx = true} : vector<8x1xf32> -> vector<8x1xf32>
    %67 = vector.broadcast %66 : vector<8x1xf32> to vector<8x16xf32>
    %68 = arith.mulf %63, %67 : vector<8x16xf32>
    %69 = arith.truncf %68 : vector<8x16xf32> to vector<8x16xbf16>
    %cst_38 = arith.constant dense<0.000000e+00> : vector<8x128xf32>
    %70 = tpu.matmul %69, %42, %cst_38 {dimension_numbers = #tpu.dot_dimension_numbers<[1], [0], [0], [1], [0, 0, 1, 1], [], []>} : vector<8x16xbf16>, vector<16x128xbf16>, vector<8x128xf32> -> vector<8x128xf32>
    %c0_39 = arith.constant 0 : index
    %c0_40 = arith.constant 0 : index
    %c0_41 = arith.constant 0 : index
    %71 = vector.load %arg10[%c0_39, %c0_40, %c0_41] : memref<1x8x128xf32, #tpu.memory_space<vmem>>, vector<1x8x128xf32>
    %72 = vector.shape_cast %71 : vector<1x8x128xf32> to vector<8x128xf32>
    %73 = vector.shape_cast %70 : vector<8x128xf32> to vector<1x8x128xf32>
    tpu.vector_store %arg10[%c0_39, %c0_40, %c0_41], %73 {strides = array<i32>} : memref<1x8x128xf32, #tpu.memory_space<vmem>>, vector<1x8x128xf32>,
    return
  }
  func.func @transform_0(%arg0: i32) -> (i32, i32, i32) {
    %c0_i32 = arith.constant 0 : i32
    %c0_i32_0 = arith.constant 0 : i32
    %c0_i32_1 = arith.constant 0 : i32
    return %arg0, %c0_i32, %c0_i32_0 : i32, i32, i32
  }
  func.func @transform_1(%arg0: i32) -> (i32, i32, i32) {
    %c0_i32 = arith.constant 0 : i32
    %c0_i32_0 = arith.constant 0 : i32
    %c0_i32_1 = arith.constant 0 : i32
    return %arg0, %c0_i32, %c0_i32_0 : i32, i32, i32
  }
  func.func @transform_2(%arg0: i32) -> (i32, i32, i32) {
    %c0_i32 = arith.constant 0 : i32
    %c0_i32_0 = arith.constant 0 : i32
    %c0_i32_1 = arith.constant 0 : i32
    return %arg0, %c0_i32, %c0_i32_0 : i32, i32, i32
  }
  func.func @transform_3(%arg0: i32) -> (i32, i32, i32) {
    %c0_i32 = arith.constant 0 : i32
    %c0_i32_0 = arith.constant 0 : i32
    %c0_i32_1 = arith.constant 0 : i32
    return %arg0, %c0_i32, %c0_i32_0 : i32, i32, i32
  }
  func.func @transform_4(%arg0: i32) -> (i32, i32, i32) {
    %c0_i32 = arith.constant 0 : i32
    %c0_i32_0 = arith.constant 0 : i32
    %c0_i32_1 = arith.constant 0 : i32
    return %arg0, %c0_i32, %c0_i32_0 : i32, i32, i32
  }
  func.func @transform_5(%arg0: i32) -> (i32, i32) {
    %c0_i32 = arith.constant 0 : i32
    %c0_i32_0 = arith.constant 0 : i32
    %c0_i32_1 = arith.constant 0 : i32
    return %c0_i32, %c0_i32_0 : i32, i32
  }
  func.func @transform_6(%arg0: i32) -> (i32, i32) {
    %c0_i32 = arith.constant 0 : i32
    %c0_i32_0 = arith.constant 0 : i32
    %c0_i32_1 = arith.constant 0 : i32
    return %c0_i32, %c0_i32_0 : i32, i32
  }
  func.func @transform_7(%arg0: i32) -> (i32, i32) {
    %c0_i32 = arith.constant 0 : i32
    %c0_i32_0 = arith.constant 0 : i32
    %c0_i32_1 = arith.constant 0 : i32
    return %c0_i32, %c0_i32_0 : i32, i32
  }
  func.func @transform_8(%arg0: i32) -> (i32, i32) {
    %c0_i32 = arith.constant 0 : i32
    %c0_i32_0 = arith.constant 0 : i32
    %c0_i32_1 = arith.constant 0 : i32
    return %c0_i32, %c0_i32_0 : i32, i32
  }
  func.func @transform_9(%arg0: i32) -> (i32, i32, i32) {
    %c0_i32 = arith.constant 0 : i32
    %c0_i32_0 = arith.constant 0 : i32
    %c0_i32_1 = arith.constant 0 : i32
    return %arg0, %c0_i32, %c0_i32_0 : i32, i32, i32
  }
}

</mosaic_0001>

<bundles_post_ra>
// kernel: graph_transformer_forward.1
= control target key start
LH: loop header
LB: loop body
LE: loop exit
PB: predicated region body
PF: predicated region fallthrough
CT: control target
= control target key end

     0   :  { %14 = vsyncpa [#allocation3], 0  ;;  %s1930_s0 = inlined_call_operand.vmem [shape: f32[3,16,128], index: 0, kind: input, shape index: {}]   ;;  %s1931_s1 = inlined_call_operand.vmem [shape: f32[3,8,128], index: 1, kind: input, shape index: {}]   ;;  %s1932_s2 = inlined_call_operand.vmem [shape: f32[3,16,1], index: 2, kind: input, shape index: {}]   ;;  %s1933_s3 = inlined_call_operand.vmem [shape: f32[3,1,16], index: 3, kind: input, shape index: {}]   ;;  %s1934_s4 = inlined_call_operand.vmem [shape: f32[3,16,1], index: 4, kind: input, shape index: {}]   ;;  %s1935_s5 = inlined_call_operand.vmem [shape: bf16[128,64], index: 5, kind: input, shape index: {}]   ;;  %s1936_s6 = inlined_call_operand.vmem [shape: bf16[128,128], index: 6, kind: input, shape index: {}]   ;;  %s1937_s7 = inlined_call_operand.vmem [shape: bf16[128,64], index: 7, kind: input, shape index: {}]   ;;  %s1938_s8 = inlined_call_operand.vmem [shape: bf16[128,64], index: 8, kind: input, shape index: {}]   ;;  %s1939_s9 = inlined_call_operand.hbm [shape: f32[3,8,128], index: 9, kind: output, shape index: {}]  }
   0x1   :  { %16 = vsyncpa [#allocation3 + $0x1], 0  ;;  %s1626_s30 = smov 0   ;;  %s1628_s10 = smov 0  }
   0x2   :  { %s1630_s11 = smov 0   ;;  %s1632_s12 = smov 0  }
   0x3 LB: > { %s1647_s13 = sadd.s32 4294967295, %s1570_s12   ;;  %s1217_s14 = sadd.s32 4294967294, %s1570_s12   ;;  %s1570_s12 = sphi %s1632_s12, %s1945_s12   ;;  %s1566_s11 = sphi %s1630_s11, %s1944_s11   ;;  %s1562_s10 = sphi %s1628_s10, %s1943_s10   ;;  %s1558_s30 = sphi %s1626_s30, %s1942_s30  }
   0x4   : > { %s1651_s15 = sadd.s32 1, %s1570_s12   ;;  %s243_s16 = sadd.s32 1, %s1566_s11 }
   0x5   : > { %s240_s17 = ssub.s32 %s1570_s12, %s1651_s15  ;;  %p253_p0 = scmp.ne.s32.totalorder %s1566_s11, %s1562_s10 }
   0x6   : > { %p241_p1 = scmp.eq.s32.totalorder %s240_s17, 0  ;;  %p254_p2 = scmp.eq.s32.totalorder %s1647_s13, 2 }
   0x7   : > { %p259_p3 = scmp.ne.s32.totalorder %s1562_s10, %s1558_s30  ;;  %p260_p4 = scmp.eq.s32.totalorder %s1217_s14, 2 }
   0x8   : > { %s1662_s18 = scalar_select %p241_p1, %s1566_s11, %s243_s16  }
   0x9   : > { %p1664_p5 = por %p254_p2, %p253_p0  ;;  %p1668_p6 = por %p260_p4, %p259_p3 }
   0xa   : > { %p1220_p7 = scmp.ge.s32.totalorder %s1570_s12, 1  ;;  %p327_p8 = scmp.lt.s32.totalorder %s1570_s12, 4 }
   0xc   : > { %p328_p9 = pnand %p1220_p7, %p327_p8 }
   0xd   : > { %v1464_v0 = vld [vmem:[%s1935_s5] sm:$0xff] (!%p328_p9)   ;;  %v1572_v1 = vmov (!%p328_p9), 0.0   ;;  %v1465_v2 = vld [vmem:[%s1935_s5 + $0x8] sm:$0xff] (!%p328_p9)   ;;  %vm1573_vm0 = vmmov (!%p328_p9), 0   ;;  %p380_p10 = scmp.lt.s32.totalorder (!%p328_p9), %s1647_s13, 2  ;;  %v1466_v3 = vld [vmem:[%s1935_s5 + $0x10] sm:$0xff] (!%p328_p9)   ;;  %v422_v21 = vlaneseq (!%p328_p9) }
   0xe   : > { %331 = sbr.rel (%p328_p9) target bundleno = 2225 (0x8b1), region = 56  ;;  %1316 = vmatprep.subr.bf16.mxu0 (!%p328_p9), %v1572_v1  ;;  %1336 = vmatprep.subr.bf16.mxu1 (!%p328_p9), %v1572_v1  ;;  %v1467_v4 = vld [vmem:[%s1935_s5 + $0x18] sm:$0xff] (!%p328_p9)   ;;  %v1468_v5 = vld [vmem:[%s1935_s5 + $0x20] sm:$0xff] (!%p328_p9)   ;;  %v1469_v6 = vld [vmem:[%s1935_s5 + $0x28] sm:$0xff] (!%p328_p9)   ;;  %v1574_v12 = vmov (!%p328_p9), 0   ;;  %vm536_vm1 = vcmask (!%p328_p9), 523264  }
   0xf   : > { %1317 = vmatpush3.bf16.msra.mxu0 (!%p328_p9), %v1464_v0  ;;  %1332 = vmatprep.mubr.msk.bf16.mxu0 (!%p328_p9), %vm1573_vm0, %v1572_v1  ;;  %v1470_v7 = vld [vmem:[%s1935_s5 + $0x30] sm:$0xff] (!%p328_p9)   ;;  %v1471_v8 = vld [vmem:[%s1935_s5 + $0x38] sm:$0xff] (!%p328_p9)   ;;  %v1743_v22 = vshrl.u32 (!%p328_p9), %v422_v21, 7  ;;  %vm585_vm3 = vcmask (!%p328_p9), 130048   ;;  %v1472_v54 = vld [vmem:[%s1936_s6] sm:$0xff] (!%p328_p9)  }
  0x10   : > { %1318 = vmatprep.subr.bf16.mxu0 (!%p328_p9), %v1572_v1  ;;  %1338 = vmatprep.mubr.msk.bf16.mxu1 (!%p328_p9), %vm1573_vm0, %v1572_v1  ;;  %v1473_v56 = vld [vmem:[%s1936_s6 + $0x8] sm:$0xff] (!%p328_p9)   ;;  %v1474_v57 = vld [vmem:[%s1936_s6 + $0x10] sm:$0xff] (!%p328_p9)   ;;  %v1475_v58 = vld [vmem:[%s1936_s6 + $0x18] sm:$0xff] (!%p328_p9)  }
  0x11   : > { %1462 = vset.pattern.permute.xlu0 (!%p328_p9), %v1574_v12  ;;  %1463 = vset.pattern.permute.xlu1 (!%p328_p9), %v1574_v12  ;;  %v424_v23 = vsub.s32 (!%p328_p9), 0, %v1743_v22  ;;  %v1476_v59 = vld [vmem:[%s1936_s6 + $0x20] sm:$0xff] (!%p328_p9)   ;;  %v1477_v60 = vld [vmem:[%s1936_s6 + $0x28] sm:$0xff] (!%p328_p9)   ;;  %v1478_v61 = vld [vmem:[%s1936_s6 + $0x30] sm:$0xff] (!%p328_p9)  }
  0x12   : > { %v1479_v62 = vld [vmem:[%s1936_s6 + $0x38] sm:$0xff] (!%p328_p9)   ;;  %v1480_v63 = vld [vmem:[%s1937_s7] sm:$0xff] (!%p328_p9)   ;;  %v1490_v21 = vld [vmem:[%s1937_s7 + $0x30] sm:$0xff] (!%p328_p9)  }
  0x13   : > { %1319 = vmatpush3.bf16.msra.mxu0 (!%p328_p9), %v1465_v2  ;;  %v1481_v2 = vld [vmem:[%s1937_s7 + $0x8] sm:$0xff] (!%p328_p9)  }
  0x14   : > { %1320 = vmatprep.subr.bf16.mxu0 (!%p328_p9), %v1572_v1 }
  0x15   : > { %s1689_s25 = scalar_select %p380_p10, %s1647_s13, 2 }
  0x17   : > { %s1699_s14 = sshll.u32 %s1689_s25, 4  ;;  %1321 = vmatpush3.bf16.msra.mxu0 %v1466_v3  ;;  %s396_s26 = scalar_lea.vmem %s1933_s3, %s1689_s25 }
  0x18   : > { %1322 = vmatprep.subr.bf16.mxu0 %v1572_v1  ;;  %s384_s28 = scalar_lea.vmem %s1930_s0, %s1699_s14  ;;  %s393_s22 = scalar_lea.vmem %s1932_s2, %s1699_s14  ;;  %v1750_v24 = vld [vmem:[%s396_s26] sm:$0x1] }
  0x19   : > { %v1721_v9 = vld [vmem:[%s384_s28] sm:$0xff]  ;;  %v1723_v10 = vld [vmem:[%s384_s28 + $0x8] sm:$0xff]  ;;  %v425_v26 = vrot.slane %v1750_v24, %v424_v23  ;;  %s401_s24 = scalar_lea.vmem %s1934_s4, %s1699_s14  ;;  %vm429_vm5 = vcmp.ge.f32.partialorder %v1750_v24, 0.0  ;;  %s1266_s14 = sshll.u32 %s1647_s13, 7 }
  0x1a   : > { %v410_v11 = vpack.c.bf16 %v1723_v10, %v1721_v9  ;;  %v405_v13 = vld [vmem:[%s393_s22] sm:$0xff]  ;;  %v406_v14 = vld [vmem:[%s393_s22 + $0x8] sm:$0xff]  ;;  %s1890_s23 = scalar_lea.hbm %s1939_s9, %s1266_s14  ;;  %s1575_s13 = smov [#allocation2]  }
  0x1b   : > { %1323 = vmatpush3.bf16.msra.mxu0 %v1467_v4  ;;  %413 = vperm.xlu0 %1462, %v405_v13   ;;  %v408_v0 = vld [vmem:[%s401_s24] sm:$0xff]  ;;  %v409_v3 = vld [vmem:[%s401_s24 + $0x8] sm:$0xff]  ;;  %v1482_v4 = vld [vmem:[%s1937_s7 + $0x10] sm:$0xff]   ;;  %s1224_s24 = sshll.u32 %s1689_s25, 3  ;;  %s377_s25 = sand.u32 1, %s1562_s10  }
  0x1c   : > { %1324 = vmatprep.subr.bf16.mxu0 %v1572_v1  ;;  %s388_s28 = scalar_lea.vmem %s1931_s1, %s1224_s24  ;;  %s1221_s29 = sshll.u32 %s377_s25, 3 }
  0x1d   : > { %s379_s16 = scalar_lea.vmem [#allocation2], %s1221_s29  ;;  %s1100_s24 = scalar_lea.sflag [#allocation3], %s377_s25 }
  0x1e   : > { %s1113_s17 = sshll.u32 %s379_s16, 4  ;;  %s1512_s27 = sshll.u32 %s1575_s13, 4  ;;  %s1885_s17 = int_to_ptr.vmem [resolvable:$true] %s1113_s17  ;;  %s1513_s27 = int_to_ptr.vmem [resolvable:$false] %s1512_s27 }
  0x1f   : > { %1325 = vmatpush3.bf16.msra.mxu0 %v1468_v5  ;;  %418 = vperm.xlu0 %1462, %v406_v14   ;;  %v1484_v5 = vld [vmem:[%s1937_s7 + $0x18] sm:$0xff]   ;;  %v1483_v14 = vld [vmem:[%s1938_s8] sm:$0xff]   ;;  %s1508_s26 = scalar_lea.vmem %s1885_s17, 128  ;;  %p1515_p0 = scmp.lt.s32.totalorder %s1885_s17, %s1513_s27 }
  0x20   : > { %1326 = vmatprep.subr.bf16.mxu0 %v1572_v1  ;;  %p1509_p11 = scmp.ne.s32.totalorder %s1885_s17, %s1508_s26 }
  0x22   : > { %p1510_p12 = pnand %p1509_p11, %p1664_p5 }
  0x23   : > { %1327 = vmatpush3.bf16.msra.mxu0 %v1469_v6  ;;  %v1486_v6 = vld [vmem:[%s1937_s7 + $0x20] sm:$0xff]  }
  0x24   : > { %1328 = vmatprep.subr.bf16.mxu0 %v1572_v1  ;;  %p1511_p13 = pneg %p1510_p12 }
  0x27   : > { %1329 = vmatpush3.bf16.msra.mxu0 %v1470_v7  ;;  %v1488_v7 = vld [vmem:[%s1937_s7 + $0x28] sm:$0xff]  }
  0x28   : > { %1330 = vmatprep.subr.bf16.mxu0 %v1572_v1 }
  0x2b   : > { %1331 = vmatpush3.bf16.msra.mxu0 %v1471_v8 }
  0x2c   : > { %1368 = vmatprep.subr.bf16.mxu0 %v1572_v1 }
  0x2e   : > { %1333 = vmatmul.mubr.bf16.vlgmr.msra.gmra.mrb[0].mxu0 %v410_v11 }
  0x2f   : > { %1384 = vmatprep.mubr.msk.bf16.mxu0 %vm1573_vm0, %v1572_v1  ;;  %1369 = vmatpush3.bf16.msra.mxu0 %v1480_v63 }
  0x30   : > { %1370 = vmatprep.subr.bf16.mxu0 %v1572_v1 }
  0x33   : > { %1371 = vmatpush3.bf16.msra.mxu0 %v1481_v2 }
  0x34   : > { %1372 = vmatprep.subr.bf16.mxu0 %v1572_v1 }
  0x37   : > { %1373 = vmatpush3.bf16.msra.mxu0 %v1482_v4 }
  0x38   : > { %1374 = vmatprep.subr.bf16.mxu0 %v1572_v1 }
  0x3b   : > { %1375 = vmatpush3.bf16.msra.mxu0 %v1484_v5 }
  0x3c   : > { %1376 = vmatprep.subr.bf16.mxu0 %v1572_v1 }
  0x3f   : > { %1377 = vmatpush3.bf16.msra.mxu0 %v1486_v6 }
  0x40   : > { %1378 = vmatprep.subr.bf16.mxu0 %v1572_v1 }
  0x43   : > { %1379 = vmatpush3.bf16.msra.mxu0 %v1488_v7 }
  0x44   : > { %1380 = vmatprep.subr.bf16.mxu0 %v1572_v1 }
  0x47   : > { %1381 = vmatpush3.bf16.msra.mxu0 %v1490_v21 }
  0x48   : > { %1382 = vmatprep.subr.bf16.mxu0 %v1572_v1 }
  0x9a   : > { %v414_v25 = vpop.permute.xlu0 %413 }
  0x9b   : > { %vm427_vm2 = vcmp.eq.f32.partialorder %v414_v25, %v425_v26  ;;  %v1493_v25 = vld [vmem:[%s1938_s8 + $0x28] sm:$0xff]  }
  0x9e   : > { %v419_v29 = vpop.permute.xlu0 %418 }
  0x9f   : > { %vm428_vm4 = vcmp.eq.f32.partialorder %v419_v29, %v425_v26  ;;  %v1492_v26 = vld [vmem:[%s1937_s7 + $0x38] sm:$0xff]   ;;  %v776_v29 = vld [vmem:[%s388_s28] sm:$0xff]  ;;  %s1514_s28 = scalar_lea.vmem %s1513_s27, 256 }
  0xa0   : > { %1383 = vmatpush3.bf16.msra.mxu0 %v1492_v26  ;;  %p1516_p1 = scmp.lt.s32.totalorder %s1514_s28, %s1508_s26 }
  0xa1   : > { %1408 = vmatprep.subr.bf16.mxu0 %v1572_v1 }
  0xa2   : > { %p1517_p2 = por %p1516_p1, %p1515_p0 }
  0xa4   : > { %p1518_p3 = pnand %p1517_p2, %p1511_p13 }
 0x101   : > { %v528_v15 = vpop.f32.mrb[0].mxu0 }
 0x102   : > { %v1334_v16 = vpop.f32.mrb[1].mxu0 }
 0x103   : > { %v531_v17 = vpop.f32.mrb[2].mxu0 }
 0x104   : > { %v535_v18 = vpack.c.bf16 %v531_v17, %v528_v15  ;;  %v1335_v19 = vpop.f32.mrb[3].mxu0  ;;  %v1485_v17 = vld [vmem:[%s1938_s8 + $0x8] sm:$0xff]  }
 0x105   : > { %v1489_v19 = vld [vmem:[%s1938_s8 + $0x18] sm:$0xff]  }
 0x106   : > { %v538_v20 = vsel %vm536_vm1, %v535_v18, 0 }
 0x107   : > { %1337 = vmatpush3.bf16.xpose.msra.mxu1 %v538_v20  ;;  %v1491_v20 = vld [vmem:[%s1938_s8 + $0x20] sm:$0xff]  }
 0x108   : > { %1342 = vmatprep.subr.bf16.mxu1 %v1572_v1 }
 0x10e   : > { %1339 = vmatmul.mubr.msk.bf16.vlgmr.msra.gmra.mrb[0].mxu1 %vm536_vm1, %v535_v18  ;;  %v1487_v18 = vld [vmem:[%s1938_s8 + $0x10] sm:$0xff]  }
 0x10f   : > { %1343 = vmatpush3.bf16.msra.mxu1 %v410_v11  ;;  %1344 = vmatprep.mubr.msk.bf16.mxu1 %vm1573_vm0, %v1572_v1 }
 0x110   : > { %1348 = vmatprep.subr.bf16.mxu1 %v1572_v1 }
 0x1e1   : > { %v574_v27 = vpop.f32.mrb[0].mxu1 }
 0x1e2   : > { %v581_v28 = vmul.f32 0.125, %v574_v27  ;;  %v1340_v30 = vpop.f32.mrb[1].mxu1  ;;  %v1494_v27 = vld [vmem:[%s1938_s8 + $0x30] sm:$0xff]  }
 0x1e3   : > { %v577_v31 = vpop.f32.mrb[2].mxu1  ;;  %v882_v30 = vpack.c.bf16 %v776_v29, %v776_v29 }
 0x1e4   : > { %v582_v32 = vmul.f32 0.125, %v577_v31  ;;  %v1341_v33 = vpop.f32.mrb[3].mxu1  ;;  %v583_v34 = vsel %vm427_vm2, %v581_v28, -1e+30  ;;  %v1495_v28 = vld [vmem:[%s1938_s8 + $0x38] sm:$0xff]  }
 0x1e5   : > { %v586_v35 = vsel %vm585_vm3, %v583_v34, -inf }
 0x1e6   : > { %587 = vmax.xlane.f32.xlu1 %v586_v35  ;;  %v584_v36 = vsel %vm428_vm4, %v582_v32, -1e+30 }
 0x1e7   : > { %v589_v37 = vsel %vm585_vm3, %v584_v36, -inf }
 0x1ea   : > { %590 = vmax.xlane.f32.xlu1 %v589_v37 }
 0x273   : > { %v588_v38 = vpop.xlane.xlu1 %587 }
 0x274   : > { %v592_v39 = vsub.f32 %v583_v34, %v588_v38 }
 0x276   : > { %v594_v40 = vmul.f32 1.442695, %v592_v39 }
 0x277   : > { %v591_v41 = vpop.xlane.xlu1 %590 }
 0x278   : > { %1496 = vpow2.f32 %v594_v40  ;;  %v593_v42 = vsub.f32 %v584_v36, %v591_v41 }
 0x27a   : > { %v596_v43 = vmul.f32 1.442695, %v593_v42 }
 0x27c   : > { %1498 = vpow2.f32 %v596_v43 }
 0x282   : > { %v1497_v44 = vpop.eup %1496 }
 0x283   : > { %v598_v45 = vsel %vm585_vm3, %v1497_v44, 0.0 }
 0x284   : > { %599 = vadd.xlane.f32.xlu0 %v598_v45 }
 0x286   : > { %v1499_v46 = vpop.eup %1498 }
 0x287   : > { %v601_v47 = vsel %vm585_vm3, %v1499_v46, 0.0 }
 0x288   : > { %602 = vadd.xlane.f32.xlu1 %v601_v47 }
 0x299   : > { %763 = vperm.xlu1 %1463, %v408_v0  }
 0x29d   : > { %768 = vperm.xlu1 %1463, %v409_v3  }
 0x311   : > { %v600_v48 = vpop.xlane.xlu0 %599 }
 0x312   : > { %1500 = vrcp.f32 %v600_v48 }
 0x315   : > { %v603_v49 = vpop.xlane.xlu1 %602 }
 0x316   : > { %1502 = vrcp.f32 %v603_v49 }
 0x319   : > { %v764_v31 = vpop.permute.xlu1 %763 }
 0x31c   : > { %v1501_v50 = vpop.eup %1500 }
 0x31d   : > { %v606_v52 = vmul.f32 %v1501_v50, %v1497_v44  ;;  %v769_v39 = vpop.permute.xlu1 %768 }
 0x320   : > { %v1503_v51 = vpop.eup %1502 }
 0x321   : > { %v607_v53 = vmul.f32 %v1503_v51, %v1499_v46 }
 0x323   : > { %v608_v55 = vpack.c.bf16 %v607_v53, %v606_v52 }
 0x325   : > { %1345 = vmatmul.mubr.msk.bf16.vlgmr.msra.gmra.mrb[4].mxu1 %vm585_vm3, %v608_v55 }
 0x326   : > { %1349 = vmatpush3.bf16.msra.mxu1 %v1472_v54  ;;  %1364 = vmatprep.mubr.msk.bf16.mxu1 %vm1573_vm0, %v1572_v1 }
 0x327   : > { %1350 = vmatprep.subr.bf16.mxu1 %v1572_v1 }
 0x32a   : > { %1351 = vmatpush3.bf16.msra.mxu1 %v1473_v56 }
 0x32b   : > { %1352 = vmatprep.subr.bf16.mxu1 %v1572_v1 }
 0x32e   : > { %1353 = vmatpush3.bf16.msra.mxu1 %v1474_v57 }
 0x32f   : > { %1354 = vmatprep.subr.bf16.mxu1 %v1572_v1 }
 0x332   : > { %1355 = vmatpush3.bf16.msra.mxu1 %v1475_v58 }
 0x333   : > { %1356 = vmatprep.subr.bf16.mxu1 %v1572_v1 }
 0x336   : > { %1357 = vmatpush3.bf16.msra.mxu1 %v1476_v59 }
 0x337   : > { %1358 = vmatprep.subr.bf16.mxu1 %v1572_v1 }
 0x33a   : > { %1359 = vmatpush3.bf16.msra.mxu1 %v1477_v60 }
 0x33b   : > { %1360 = vmatprep.subr.bf16.mxu1 %v1572_v1 }
 0x33e   : > { %1361 = vmatpush3.bf16.msra.mxu1 %v1478_v61 }
 0x33f   : > { %1362 = vmatprep.subr.bf16.mxu1 %v1572_v1 }
 0x342   : > { %1363 = vmatpush3.bf16.msra.mxu1 %v1479_v62 }
 0x343   : > { %1388 = vmatprep.subr.bf16.mxu1 %v1572_v1 }
 0x3f8   : > { %v646_v8 = vpop.f32.mrb[4].mxu1 }
 0x3f9   : > { %v1346_v11 = vpop.f32.mrb[5].mxu1 }
 0x3fa   : > { %v649_v13 = vpop.f32.mrb[6].mxu1 }
 0x3fb   : > { %v653_v15 = vpack.c.bf16 %v649_v13, %v646_v8  ;;  %v1347_v16 = vpop.f32.mrb[7].mxu1 }
 0x3fd   : > { %1365 = vmatmul.mubr.bf16.vlgmr.msra.gmra.mrb[8].mxu1 %v653_v15 }
 0x3fe   : > { %1389 = vmatpush3.bf16.msra.mxu1 %v1483_v14  ;;  %1404 = vmatprep.mubr.msk.bf16.mxu1 %vm1573_vm0, %v1572_v1 }
 0x3ff   : > { %1390 = vmatprep.subr.bf16.mxu1 %v1572_v1 }
 0x402   : > { %1391 = vmatpush3.bf16.msra.mxu1 %v1485_v17 }
 0x403   : > { %1392 = vmatprep.subr.bf16.mxu1 %v1572_v1 }
 0x406   : > { %1393 = vmatpush3.bf16.msra.mxu1 %v1487_v18 }
 0x407   : > { %1394 = vmatprep.subr.bf16.mxu1 %v1572_v1 }
 0x40a   : > { %1395 = vmatpush3.bf16.msra.mxu1 %v1489_v19 }
 0x40b   : > { %1396 = vmatprep.subr.bf16.mxu1 %v1572_v1 }
 0x40e   : > { %1397 = vmatpush3.bf16.msra.mxu1 %v1491_v20 }
 0x40f   : > { %1398 = vmatprep.subr.bf16.mxu1 %v1572_v1 }
 0x412   : > { %1399 = vmatpush3.bf16.msra.mxu1 %v1493_v25 }
 0x413   : > { %1400 = vmatprep.subr.bf16.mxu1 %v1572_v1 }
 0x416   : > { %1401 = vmatpush3.bf16.msra.mxu1 %v1494_v27 }
 0x417   : > { %1402 = vmatprep.subr.bf16.mxu1 %v1572_v1 }
 0x41a   : > { %1403 = vmatpush3.bf16.msra.mxu1 %v1495_v28 }
 0x41d   : > { %1405 = vmatmul.mubr.bf16.vlgmr.msra.gmra.mrb[12].mxu1 %v882_v30 }
 0x4d0   : > { %v752_v32 = vpop.f32.mrb[8].mxu1 }
 0x4d1   : > { %v759_v33 = vmax.f32 %v752_v32, 0.0  ;;  %v1366_v34 = vpop.f32.mrb[9].mxu1 }
 0x4d2   : > { %v755_v35 = vpop.f32.mrb[10].mxu1 }
 0x4d3   : > { %v771_v36 = vmul.f32 %v764_v31, %v759_v33  ;;  %v760_v37 = vmax.f32 %v755_v35, 0.0  ;;  %v1367_v38 = vpop.f32.mrb[11].mxu1 }
 0x4d5   : > { %v772_v40 = vmul.f32 %v769_v39, %v760_v37  ;;  %v773_v41 = vadd.f32 %v771_v36, %v1721_v9 }
 0x4d7   : > { %v774_v42 = vadd.f32 %v772_v40, %v1723_v10  ;;  %v1036_v10 = vsel %vm429_vm5, 1, %v1574_v12 }
 0x4d8   : > { %v1040_v54 = vrot.slane %v1036_v10, %v424_v23 }
 0x4d9   : > { %v775_v43 = vpack.c.bf16 %v774_v42, %v773_v41 }
 0x4da   : > { %vm1041_vm6 = vcmp.eq.s32.totalorder %v1040_v54, 1 }
 0x4db   : > { %1385 = vmatmul.mubr.bf16.vlgmr.msra.gmra.mrb[4].mxu0 %v775_v43 }
 0x4dc   : > { %1410 = vmatprep.mubr.msk.bf16.mxu0 %vm1573_vm0, %v1572_v1 }
 0x4f0   : > { %v981_v44 = vpop.f32.mrb[12].mxu1 }
 0x4f1   : > { %v1406_v45 = vpop.f32.mrb[13].mxu1  ;;  %v987_v9 = vpack.c.bf16 %v981_v44, %v981_v44 }
 0x4f2   : > { %v984_v46 = vpop.f32.mrb[14].mxu1 }
 0x4f3   : > { %v1407_v47 = vpop.f32.mrb[15].mxu1 }
 0x5ae   : > { %v875_v48 = vpop.f32.mrb[4].mxu0 }
 0x5af   : > { %v1386_v49 = vpop.f32.mrb[5].mxu0 }
 0x5b0   : > { %v878_v50 = vpop.f32.mrb[6].mxu0 }
 0x5b1   : > { %v988_v51 = vpack.c.bf16 %v878_v50, %v875_v48  ;;  %v1387_v52 = vpop.f32.mrb[7].mxu0 }
 0x5b3   : > { %v993_v53 = vsel %vm536_vm1, %v988_v51, 0 }
 0x5b4   : > { %1409 = vmatpush3.bf16.xpose.msra.mxu0 %v993_v53 }
 0x5b5   : > { %1414 = vmatprep.subr.bf16.mxu0 %v1572_v1 }
 0x5bb   : > { %1411 = vmatmul.mubr.msk.bf16.vlgmr.msra.gmra.mrb[8].mxu0 %vm536_vm1, %v987_v9 }
 0x5bc   : > { %1415 = vmatpush3.bf16.msra.mxu0 %v775_v43  ;;  %1416 = vmatprep.mubr.msk.bf16.mxu0 %vm1573_vm0, %v1572_v1 }
 0x68e   : > { %v1029_v55 = vpop.f32.mrb[8].mxu0 }
 0x68f   : > { %v1035_v56 = vmul.f32 0.125, %v1029_v55  ;;  %v1412_v57 = vpop.f32.mrb[9].mxu0 }
 0x690   : > { %v1032_v58 = vpop.f32.mrb[10].mxu0 }
 0x691   : > { %v1413_v59 = vpop.f32.mrb[11].mxu0  ;;  %v1042_v60 = vsel %vm1041_vm6, %v1035_v56, -1e+30 }
 0x692   : > { %v1043_v61 = vsel %vm585_vm3, %v1042_v60, -inf }
 0x693   : > { %1044 = vmax.xlane.f32.xlu1 %v1043_v61 }
 0x720   : > { %v1045_v62 = vpop.xlane.xlu1 %1044 }
 0x721   : > { %v1046_v1 = vsub.f32 %v1042_v60, %v1045_v62 }
 0x723   : > { %v1047_v24 = vmul.f32 1.442695, %v1046_v1 }
 0x725   : > { %1504 = vpow2.f32 %v1047_v24 }
 0x72f   : > { %v1505_v12 = vpop.eup %1504 }
 0x730   : > { %v1049_v22 = vsel %vm585_vm3, %v1505_v12, 0.0 }
 0x731   : > { %1050 = vadd.xlane.f32.xlu0 %v1049_v22 }
 0x7be   : > { %v1051_v23 = vpop.xlane.xlu0 %1050 }
 0x7bf   : > { %1506 = vrcp.f32 %v1051_v23 }
 0x7c9   : > { %v1507_v63 = vpop.eup %1506 }
 0x7ca   : > { %v1053_v0 = vmul.f32 %v1507_v63, %v1505_v12 }
 0x7cc   : > { %v1054_v2 = vpack.c.bf16 %v1053_v0, %v1053_v0 }
 0x7ce   : > { %1417 = vmatmul.mubr.msk.bf16.vlgmr.msra.gmra.mrb[12].mxu0 %vm585_vm3, %v1054_v2 }
 0x8a1   : > { %v1092_v3 = vpop.f32.mrb[12].mxu0 }
 0x8a2   : > { %1098 = vst [vmem:[%s379_s16] sm:$0xff] %v1092_v3  ;;  %v1418_v4 = vpop.f32.mrb[13].mxu0 }
 0x8a3   : > { %v1095_v5 = vpop.f32.mrb[14].mxu0 }
 0x8a4   : > { %1521 = shalt.err (!%p1518_p3)
}
 0x8a5   : > { %s1522_s25 = scalar_lea.hbm %s1890_s23, 128  ;;  %s1526_s14 = scalar_lea.hbm %s1939_s9, 384 }
 0x8a6   : > { %p1523_p4 = scmp.ne.s32.totalorder %s1890_s23, %s1522_s25  ;;  %p1527_p9 = scmp.lt.u32.totalorder %s1890_s23, %s1939_s9 }
 0x8a7   : > { %p1528_p10 = scmp.lt.u32.totalorder %s1526_s14, %s1522_s25  ;;  %p1530_p12 = scmp.lt.u32.totalorder %s1522_s25, %s1890_s23 }
 0x8a8   : > { %p1524_p7 = pnand %p1523_p4, %p1664_p5 }
 0x8a9   : > { %p1529_p11 = por %p1528_p10, %p1527_p9 }
 0x8aa   : > { %p1525_p8 = pneg %p1524_p7 }
 0x8ab   : > { %p1531_p13 = por %p1530_p12, %p1529_p11 }
 0x8ad   : > { %p1532_p0 = pnand %p1531_p13, %p1525_p8 }
 0x8af   : > { %1535 = shalt.err (!%p1532_p0)
}
 0x8b0   : > { %1420 = dma.vmem_to_hbm [thread:$0]  (%p1664_p5), %s1885_s17, 128, %s1890_s23, %s1100_s24   ;;  %v1419_v6 = vpop.f32.mrb[15].mxu0 }
 0x8b1 PF: > { %p1426_p1 = scmp.ge.s32.totalorder %s1570_s12, 2  ;;  %s1125_s26 = sand.u32 1, %s1558_s30  }
 0x8b2   : > { %s1126_s13 = scalar_lea.sflag [#allocation3], %s1125_s26 }
 0x8b3   : > { %p1423_p2 = pnand %p1426_p1, %p1668_p6 }
 0x8b5   : > { %1553 = dma.done.wait (!%p1423_p2), %s1126_s13, 128  }
 0x8b6   : > { %1555 = vsyncadd (!%p1423_p2), %s1126_s13, 4294967168  ;;  %p19_p3 = scmp.ge.s32.totalorder %s1651_s15, 5   ;;  %s1942_s30 = smov %s1562_s10 }
 0x8b7   : > { %s1943_s10 = smov %s1566_s11  ;;  %s1944_s11 = smov %s1662_s18 }
 0x8b8   : > { %s1945_s12 = smov %s1651_s15  ;;  %21 = sbr.rel (!%p19_p3) target bundleno = 3 (0x3), region = 103 }
 0x8bf   :  { %1131 = vsyncpa [#allocation3], 1 }
 0x8c0   :  { %1133 = vsyncpa [#allocation3 + $0x1], 1 }

</bundles_post_ra>
